<compile_context>
chip_gen: v5e
topology: v5e:2x2
jax: 0.10.0
libtpu: 0.0.40
codegen_flags: <defaults>
</compile_context>

<pallas_src>
import functools

import jax
import jax.numpy as jnp
import numpy as np
from jax import lax
from jax.experimental import pallas as pl
from jax.experimental.pallas import tpu as pltpu


def _round_up(x, m):
    return -(-x // m) * m


def _pixel_shuffle_kernel(x_ref, o_ref, *, r, cb, H, W, acc_dtype, precision):
    """One group-block tile.

    x_ref : (cb, r*r, H, W)   the r*r input sub-channels of cb output channels
    o_ref : (cb*H, r*r*W)     rows = (group, h), lanes = (a, w, b);
                              layout-identical to (cb, H*r, W*r)
    """
    r2 = r * r
    M = cb * H
    Wn = r2 * W

    # One-hot column-interleave matrices built in-kernel (hoisted iotas; JAX
    # does not CSE broadcasts).  CM_q[w, a*r*W + w*r + b] = 1 for q = a*r + b.
    out_col = lax.broadcasted_iota(jnp.int32, (W, Wn), 1)   # output lane index
    in_col = lax.broadcasted_iota(jnp.int32, (W, Wn), 0)    # input column w
    ones = jnp.ones((W, Wn), dtype=acc_dtype)
    zeros = jnp.zeros((W, Wn), dtype=acc_dtype)

    acc = jnp.zeros((M, Wn), dtype=acc_dtype)
    for a in range(r):
        for b in range(r):
            q = a * r + b
            cm_q = jnp.where(out_col == in_col * r + (a * r * W + b), ones, zeros)
            # LHS slab for sub-channel q: (cb*H, W).  Exact 0/1 matmul; the
            # per-q adds land on disjoint lane ranges (pure VPU filler).
            xq = x_ref[:, q, :, :].reshape(M, W).astype(acc_dtype)
            acc = acc + jnp.dot(xq, cm_q,
                                preferred_element_type=acc_dtype,
                                precision=precision)
    # Single lane-dense, unmasked full-block store.
    o_ref[...] = acc.astype(o_ref.dtype)


def _tpu_vmem_and_cores():
    """Physical per-core VMEM bytes and TensorCore count (best effort)."""
    vmem = 64 * 1024 * 1024            # conservative default (v7x-sized)
    cores = None
    try:
        info = pltpu.get_tpu_info()
        vmem = int(getattr(info, "vmem_capacity_bytes", vmem)) or vmem
        for name in ("num_cores", "core_count", "tensorcore_count"):
            v = getattr(info, name, None)
            if isinstance(v, int) and v > 0:
                cores = v
                break
    except Exception:
        pass
    if cores is None:
        # Heuristic: 64 MiB-per-core parts (v7x) have 2 TensorCores per chip.
        cores = 2 if vmem <= 64 * 1024 * 1024 else 1
    return vmem, cores


def _block_footprint_bytes(cb, r, H, W, x_itemsize, acc_itemsize):
    """VMEM bytes per grid step: double-buffered padded I/O blocks + temps."""
    r2 = r * r
    lane = 128
    sub_x = max(8, 32 // x_itemsize)      # sublane granularity of x / out dtype
    sub_a = max(8, 32 // acc_itemsize)    # ... of the accumulator dtype
    in_block = cb * r2 * _round_up(H, sub_x) * _round_up(W, lane) * x_itemsize
    out_block = _round_up(cb * H, sub_x) * _round_up(r2 * W, lane) * x_itemsize
    pipelined = 2 * (in_block + out_block)                      # double buffering
    acc = _round_up(cb * H, sub_a) * _round_up(r2 * W, lane) * acc_itemsize
    xq = _round_up(cb * H, sub_a) * _round_up(W, lane) * acc_itemsize
    cm = _round_up(W, sub_a) * _round_up(r2 * W, lane) * acc_itemsize
    return pipelined + acc + xq + cm


def _pick_group_block(G, r, H, W, x_itemsize, acc_itemsize, budget, num_cores):
    """Largest divisor of G (= N*C_out) whose padded footprint fits `budget`."""
    divisors = [d for d in range(1, G + 1) if G % d == 0]
    # Output block's second-minor dim (cb*H) must be 8-aligned or the full dim.
    legal = [d for d in divisors if d == G or (d * H) % 8 == 0]
    fitting = [d for d in legal
               if _block_footprint_bytes(d, r, H, W, x_itemsize, acc_itemsize) <= budget]
    if not fitting:
        return min(legal)
    if num_cores > 1 and G >= num_cores:
        # Prefer a step count that shards evenly across TensorCores (v7x).
        balanced = [d for d in fitting if (G // d) % num_cores == 0]
        if balanced:
            return max(balanced)
    return max(fitting)


def pixel_shuffle_2d(x, upscale_factor, *, group_block=None):
    """Pallas pixel shuffle: (N, C, H, W) -> (N, C//r^2, H*r, W*r)."""
    r = int(upscale_factor)
    if x.ndim != 4:
        raise NotImplementedError("Pallas kernel implements the 2-D (NCHW) case only.")
    N, C, H, W = x.shape
    r2 = r * r
    if C % r2 != 0:
        raise ValueError("channels must be divisible by upscale_factor**2")
    C_out = C // r2
    G = N * C_out                         # flattened (batch, out-channel) groups

    # MXU dtype: exact for floats (0/1 permutation matrix).  Integers ride an
    # f32 path, exact only for |x| < 2**24.
    # TODO(synk): add an exact wide-integer path if needed.
    if x.dtype == jnp.bfloat16:
        acc_dtype, precision = jnp.bfloat16, None
    else:
        acc_dtype, precision = jnp.float32, lax.Precision.HIGHEST

    x_itemsize = np.dtype(x.dtype).itemsize
    acc_itemsize = np.dtype(acc_dtype).itemsize

    vmem_phys, num_cores = _tpu_vmem_and_cores()
    mib = 1024 * 1024
    phys_cap = max(32 * mib, vmem_phys - 16 * mib)        # Mosaic-internal headroom
    headroom = 8 * mib
    budget = min(vmem_phys // 2, phys_cap - headroom)     # ~64 MiB v5e/v6e, ~32 MiB v7x

    if group_block is None:
        cb = _pick_group_block(G, r, H, W, x_itemsize, acc_itemsize, budget, num_cores)
    else:
        cb = int(group_block)
        if G % cb != 0:
            raise ValueError("group_block must divide N * (C // r**2)")
        if cb != G and (cb * H) % 8 != 0:
            raise ValueError("group_block * H must be a multiple of 8 (sublane alignment)")
        if _block_footprint_bytes(cb, r, H, W, x_itemsize, acc_itemsize) > phys_cap - headroom:
            raise ValueError("group_block does not fit in VMEM on this TPU generation")

    footprint = _block_footprint_bytes(cb, r, H, W, x_itemsize, acc_itemsize)
    vmem_limit = int(min(phys_cap, max(32 * mib, footprint + headroom)))

    # Free, layout-identical reshapes (NCHW is contiguous):
    #   input : (N, C, H, W)   -> (G, r*r, H, W)
    #   output: (G*H, r*r*W)   == (N, C_out, H*r, W*r)
    xr = x.reshape(G, r2, H, W)

    kernel = functools.partial(_pixel_shuffle_kernel, r=r, cb=cb, H=H, W=W,
                               acc_dtype=acc_dtype, precision=precision)
    steps = G // cb

    grid_spec = pltpu.PrefetchScalarGridSpec(
        num_scalar_prefetch=0,
        grid=(steps,),
        in_specs=[pl.BlockSpec((cb, r2, H, W), lambda i: (i, 0, 0, 0))],
        out_specs=pl.BlockSpec((cb * H, r2 * W), lambda i: (i, 0)),
    )

    out2 = pl.pallas_call(
        kernel,
        out_shape=jax.ShapeDtypeStruct((G * H, r2 * W), x.dtype),
        grid_spec=grid_spec,
        compiler_params=pltpu.CompilerParams(
            dimension_semantics=("parallel",),
            vmem_limit_bytes=vmem_limit),
        cost_estimate=pl.CostEstimate(
            flops=2 * int(x.size) * r2 * W,             # the 0/1 permutation matmuls
            transcendentals=0,
            bytes_accessed=2 * int(x.size) * x_itemsize),
    )(xr)

    # Layout-identical view back to the NCHW pixel-shuffle output shape.
    return out2.reshape(N, C_out, H * r, W * r)


def _reference_pixel_shuffle(x, r):
    """Pure-JAX reference matching the PyTorch module for 2-D data."""
    N, C, H, W = x.shape
    co = C // (r * r)
    xv = x.reshape(N, co, r, r, H, W)
    y = jnp.transpose(xv, (0, 1, 4, 2, 5, 3))
    return y.reshape(N, co, H * r, W * r)


if __name__ == "__main__":
    key = jax.random.PRNGKey(0)
    k1, k2, k3 = jax.random.split(key, 3)

    # Case 1: r=2, f32, (2, 8, 16, 16) -> (2, 2, 32, 32).
    x = jax.random.normal(k1, (2, 8, 16, 16), dtype=jnp.float32)
    out = jax.block_until_ready(pixel_shuffle_2d(x, 2))
    ref = _reference_pixel_shuffle(x, 2)
    np.testing.assert_allclose(np.asarray(out), np.asarray(ref), rtol=0, atol=0)

    # Case 2: r=3, f32, (1, 18, 8, 16) -> (1, 2, 24, 48).
    x3 = jax.random.normal(k2, (1, 18, 8, 16), dtype=jnp.float32)
    out3 = jax.block_until_ready(pixel_shuffle_2d(x3, 3))
    ref3 = _reference_pixel_shuffle(x3, 3)
    np.testing.assert_allclose(np.asarray(out3), np.asarray(ref3), rtol=0, atol=0)

    # Case 3: r=2, bf16 — exercises the bf16 MXU-result path (exact for a 0/1 permutation).
    xb = jax.random.normal(k3, (2, 8, 16, 16), dtype=jnp.float32).astype(jnp.bfloat16)
    outb = jax.block_until_ready(pixel_shuffle_2d(xb, 2))
    refb = _reference_pixel_shuffle(xb, 2)
    np.testing.assert_allclose(np.asarray(outb, dtype=np.float32),
                               np.asarray(refb, dtype=np.float32), rtol=0, atol=0)

    print("KERNEL_OK")
</pallas_src>

<mosaic_0001>
module attributes {stable_mosaic.version = 11 : i64} {
  func.func @_pixel_shuffle_kernel(%arg0: i32, %arg1: memref<2x4x16x16xf32, #tpu.memory_space<vmem>>, %arg2: memref<32x64xf32, #tpu.memory_space<vmem>>) attributes {dimension_semantics = [#tpu.dimension_semantics<parallel>], iteration_bounds = array<i64: 2>, scalar_prefetch = 0 : i64, scratch_operands = 0 : i64, tpu.core_type = #tpu.core_type<tc>, window_params = [{transform_indices = @transform_0, window_bounds = array<i64: 2, 4, 16, 16>}, {transform_indices = @transform_1, window_bounds = array<i64: 32, 64>}]} {
    %0 = tpu.iota {dimensions = array<i32: 1>} : vector<16x64xi32>
    %1 = tpu.iota {dimensions = array<i32: 0>} : vector<16x64xi32>
    %cst = arith.constant 1.000000e+00 : f32
    %2 = vector.broadcast %cst : f32 to vector<16x64xf32>
    %cst_0 = arith.constant 0.000000e+00 : f32
    %3 = vector.broadcast %cst_0 : f32 to vector<16x64xf32>
    %cst_1 = arith.constant 0.000000e+00 : f32
    %4 = vector.broadcast %cst_1 : f32 to vector<32x64xf32>
    %c2_i32 = arith.constant 2 : i32
    %5 = vector.broadcast %c2_i32 : i32 to vector<16x64xi32>
    %6 = arith.muli %1, %5 : vector<16x64xi32>
    %c0_i32 = arith.constant 0 : i32
    %7 = vector.broadcast %c0_i32 : i32 to vector<16x64xi32>
    %8 = arith.addi %6, %7 : vector<16x64xi32>
    %9 = arith.cmpi eq, %0, %8 : vector<16x64xi32>
    %10 = arith.select %9, %2, %3 : vector<16x64xi1>, vector<16x64xf32>
    %c0 = arith.constant 0 : index
    %c0_2 = arith.constant 0 : index
    %c0_3 = arith.constant 0 : index
    %c0_4 = arith.constant 0 : index
    %11 = vector.load %arg1[%c0, %c0_2, %c0_3, %c0_4] : memref<2x4x16x16xf32, #tpu.memory_space<vmem>>, vector<2x1x16x16xf32>
    %12 = vector.shape_cast %11 : vector<2x1x16x16xf32> to vector<2x16x16xf32>
    %13 = vector.shape_cast %12 : vector<2x16x16xf32> to vector<32x16xf32>
    %cst_5 = arith.constant dense<0.000000e+00> : vector<32x64xf32>
    %14 = tpu.matmul %13, %10, %cst_5 {dimension_numbers = #tpu.dot_dimension_numbers<[1], [0], [0], [1], [0, 0, 1, 1], [], []>, precision = #tpu.contract_precision<fp32>} : vector<32x16xf32>, vector<16x64xf32>, vector<32x64xf32> -> vector<32x64xf32>
    %15 = arith.addf %4, %14 : vector<32x64xf32>
    %c2_i32_6 = arith.constant 2 : i32
    %16 = vector.broadcast %c2_i32_6 : i32 to vector<16x64xi32>
    %17 = arith.muli %1, %16 : vector<16x64xi32>
    %c1_i32 = arith.constant 1 : i32
    %18 = vector.broadcast %c1_i32 : i32 to vector<16x64xi32>
    %19 = arith.addi %17, %18 : vector<16x64xi32>
    %20 = arith.cmpi eq, %0, %19 : vector<16x64xi32>
    %21 = arith.select %20, %2, %3 : vector<16x64xi1>, vector<16x64xf32>
    %c0_7 = arith.constant 0 : index
    %c1 = arith.constant 1 : index
    %c0_8 = arith.constant 0 : index
    %c0_9 = arith.constant 0 : index
    %22 = vector.load %arg1[%c0_7, %c1, %c0_8, %c0_9] : memref<2x4x16x16xf32, #tpu.memory_space<vmem>>, vector<2x1x16x16xf32>
    %23 = vector.shape_cast %22 : vector<2x1x16x16xf32> to vector<2x16x16xf32>
    %24 = vector.shape_cast %23 : vector<2x16x16xf32> to vector<32x16xf32>
    %cst_10 = arith.constant dense<0.000000e+00> : vector<32x64xf32>
    %25 = tpu.matmul %24, %21, %cst_10 {dimension_numbers = #tpu.dot_dimension_numbers<[1], [0], [0], [1], [0, 0, 1, 1], [], []>, precision = #tpu.contract_precision<fp32>} : vector<32x16xf32>, vector<16x64xf32>, vector<32x64xf32> -> vector<32x64xf32>
    %26 = arith.addf %15, %25 : vector<32x64xf32>
    %c2_i32_11 = arith.constant 2 : i32
    %27 = vector.broadcast %c2_i32_11 : i32 to vector<16x64xi32>
    %28 = arith.muli %1, %27 : vector<16x64xi32>
    %c32_i32 = arith.constant 32 : i32
    %29 = vector.broadcast %c32_i32 : i32 to vector<16x64xi32>
    %30 = arith.addi %28, %29 : vector<16x64xi32>
    %31 = arith.cmpi eq, %0, %30 : vector<16x64xi32>
    %32 = arith.select %31, %2, %3 : vector<16x64xi1>, vector<16x64xf32>
    %c0_12 = arith.constant 0 : index
    %c2 = arith.constant 2 : index
    %c0_13 = arith.constant 0 : index
    %c0_14 = arith.constant 0 : index
    %33 = vector.load %arg1[%c0_12, %c2, %c0_13, %c0_14] : memref<2x4x16x16xf32, #tpu.memory_space<vmem>>, vector<2x1x16x16xf32>
    %34 = vector.shape_cast %33 : vector<2x1x16x16xf32> to vector<2x16x16xf32>
    %35 = vector.shape_cast %34 : vector<2x16x16xf32> to vector<32x16xf32>
    %cst_15 = arith.constant dense<0.000000e+00> : vector<32x64xf32>
    %36 = tpu.matmul %35, %32, %cst_15 {dimension_numbers = #tpu.dot_dimension_numbers<[1], [0], [0], [1], [0, 0, 1, 1], [], []>, precision = #tpu.contract_precision<fp32>} : vector<32x16xf32>, vector<16x64xf32>, vector<32x64xf32> -> vector<32x64xf32>
    %37 = arith.addf %26, %36 : vector<32x64xf32>
    %c2_i32_16 = arith.constant 2 : i32
    %38 = vector.broadcast %c2_i32_16 : i32 to vector<16x64xi32>
    %39 = arith.muli %1, %38 : vector<16x64xi32>
    %c33_i32 = arith.constant 33 : i32
    %40 = vector.broadcast %c33_i32 : i32 to vector<16x64xi32>
    %41 = arith.addi %39, %40 : vector<16x64xi32>
    %42 = arith.cmpi eq, %0, %41 : vector<16x64xi32>
    %43 = arith.select %42, %2, %3 : vector<16x64xi1>, vector<16x64xf32>
    %c0_17 = arith.constant 0 : index
    %c3 = arith.constant 3 : index
    %c0_18 = arith.constant 0 : index
    %c0_19 = arith.constant 0 : index
    %44 = vector.load %arg1[%c0_17, %c3, %c0_18, %c0_19] : memref<2x4x16x16xf32, #tpu.memory_space<vmem>>, vector<2x1x16x16xf32>
    %45 = vector.shape_cast %44 : vector<2x1x16x16xf32> to vector<2x16x16xf32>
    %46 = vector.shape_cast %45 : vector<2x16x16xf32> to vector<32x16xf32>
    %cst_20 = arith.constant dense<0.000000e+00> : vector<32x64xf32>
    %47 = tpu.matmul %46, %43, %cst_20 {dimension_numbers = #tpu.dot_dimension_numbers<[1], [0], [0], [1], [0, 0, 1, 1], [], []>, precision = #tpu.contract_precision<fp32>} : vector<32x16xf32>, vector<16x64xf32>, vector<32x64xf32> -> vector<32x64xf32>
    %48 = arith.addf %37, %47 : vector<32x64xf32>
    %c0_21 = arith.constant 0 : index
    %c0_22 = arith.constant 0 : index
    %49 = vector.load %arg2[%c0_21, %c0_22] : memref<32x64xf32, #tpu.memory_space<vmem>>, vector<32x64xf32>
    tpu.vector_store %arg2[%c0_21, %c0_22], %48 {strides = array<i32>} : memref<32x64xf32, #tpu.memory_space<vmem>>, vector<32x64xf32>,
    return
  }
  func.func @transform_0(%arg0: i32) -> (i32, i32, i32, i32) {
    %c0_i32 = arith.constant 0 : i32
    %c0_i32_0 = arith.constant 0 : i32
    %c0_i32_1 = arith.constant 0 : i32
    %c0_i32_2 = arith.constant 0 : i32
    return %arg0, %c0_i32, %c0_i32_0, %c0_i32_1 : i32, i32, i32, i32
  }
  func.func @transform_1(%arg0: i32) -> (i32, i32) {
    %c0_i32 = arith.constant 0 : i32
    %c0_i32_0 = arith.constant 0 : i32
    return %arg0, %c0_i32 : i32, i32
  }
}

</mosaic_0001>

<bundles_post_ra>
// kernel: tpu_custom_call.1
= control target key start
LH: loop header
LB: loop body
LE: loop exit
PB: predicated region body
PF: predicated region fallthrough
CT: control target
= control target key end

     0   :  { %6 = vsyncpa [#allocation3], 0  ;;  %s2028_s0 = inlined_call_operand.hbm [shape: f32[4,4,16,16], index: 0, kind: input, shape index: {}]   ;;  %s2029_s1 = inlined_call_operand.hbm [shape: f32[64,64], index: 1, kind: output, shape index: {}]  }
   0x1   :  { %8 = vsyncpa [#allocation3 + $0x1], 0 }
   0x2   :  { %9 = vsyncpa [#allocation4], 0 }
   0x3   :  { %11 = vsyncpa [#allocation4 + $0x1], 0  ;;  %s1519_s6 = smov 0   ;;  %s1521_s7 = smov 0  }
   0x4   :  { %s1523_s8 = smov 0   ;;  %s1525_s9 = smov 0  }
   0x5 LB: > { %s1540_s10 = sadd.s32 4294967295, %s1501_s9   ;;  %s1299_s11 = sadd.s32 4294967294, %s1501_s9   ;;  %s1501_s9 = sphi %s1525_s9, %s2039_s9   ;;  %s1497_s8 = sphi %s1523_s8, %s2038_s8   ;;  %s1493_s7 = sphi %s1521_s7, %s2037_s7   ;;  %s1489_s6 = sphi %s1519_s6, %s2036_s6  }
   0x6   : > { %s1544_s12 = sadd.s32 1, %s1501_s9   ;;  %s24_s13 = sadd.s32 1, %s1497_s8 }
   0x7   : > { %s21_s14 = ssub.s32 %s1501_s9, %s1544_s12  ;;  %p31_p0 = scmp.ne.s32.totalorder %s1497_s8, %s1493_s7 }
   0x8   : > { %p22_p1 = scmp.eq.s32.totalorder %s21_s14, 0  ;;  %p32_p2 = scmp.eq.s32.totalorder %s1501_s9, 0 }
   0x9   : > { %p37_p3 = scmp.ne.s32.totalorder %s1493_s7, %s1489_s6  ;;  %p38_p4 = scmp.eq.s32.totalorder %s1540_s10, 0 }
   0xa   : > { %s1556_s15 = scalar_select %p22_p1, %s1497_s8, %s24_s13  }
   0xb   : > { %p1558_p5 = por %p32_p2, %p31_p0  ;;  %p1562_p6 = por %p38_p4, %p37_p3 }
   0xc   : > { %p61_p7 = scmp.eq.s32.totalorder %s1540_s10, 1  ;;  %p67_p8 = scmp.eq.s32.totalorder %s1299_s11, 1 }
   0xd   : > { %p1365_p10 = scmp.lt.s32.totalorder %s1501_s9, 2  ;;  %s87_s20 = sand.u32 1, %s1497_s8  }
   0xe   : > { %p1569_p11 = por %p61_p7, %p31_p0  ;;  %p1573_p12 = por %p67_p8, %p37_p3 }
   0xf   : > { %s1351_s21 = sshll.u32 %s1501_s9, 7  ;;  %s1302_s22 = sshll.u32 %s87_s20, 7 }
  0x10   : > { %s97_s25 = scalar_lea.hbm %s2028_s0, %s1351_s21  ;;  %s91_s27 = scalar_lea.vmem [#allocation2], %s1302_s22 }
  0x11   : > { %s98_s26 = sshll.u32 %s97_s25, 4  ;;  %s100_s28 = sshll.u32 %s91_s27, 4  ;;  %s99_s26 = int_to_ptr.hbm [resolvable:$true] %s98_s26  ;;  %s101_s28 = int_to_ptr.vmem [resolvable:$true] %s100_s28 }
  0x12   : > { %p1584_p13 = pnand %p1365_p10, %p1558_p5  ;;  %p1306_p0 = scmp.ge.s32.totalorder %s1501_s9, 1 }
  0x13   : > { %p108_p1 = scmp.lt.s32.totalorder %s1501_s9, 3  ;;  %s88_s30 = scalar_lea.sflag [#allocation3], %s87_s20 }
  0x14   : > { %s1405_s2 = sshra.s32 %s99_s26, 4  ;;  %p1409_p3 = pneg %p1584_p13  ;;  %s1406_s2 = int_to_ptr.hbm [resolvable:$true] %s1405_s2 }
  0x15   : > { %s1407_s3 = scalar_lea.hbm %s1406_s2, 128  ;;  %s1412_s11 = scalar_lea.hbm %s2028_s0, 256 }
  0x16   : > { %p1408_p2 = scmp.ne.s32.totalorder %s1406_s2, %s1407_s3  ;;  %p1413_p5 = scmp.lt.s32.totalorder %s1406_s2, %s2028_s0 }
  0x17   : > { %p1414_p8 = scmp.lt.s32.totalorder %s1412_s11, %s1407_s3 }
  0x18   : > { %p1410_p4 = pnand %p1409_p3, %p1408_p2 }
  0x19   : > { %p1415_p10 = por %p1414_p8, %p1413_p5 }
  0x1a   : > { %p1411_p7 = pneg %p1410_p4 }
  0x1c   : > { %p1416_p9 = pnand %p1415_p10, %p1411_p7 }
  0x1e   : > { %1419 = shalt.err (!%p1416_p9)
}
  0x1f   : > { %s1503_s16 = smov 128   ;;  %s1504_s20 = smov 8  }
  0x20   : > { %1360 = dma.hbm_to_vmem [thread:$0]  (!%p1584_p13), %s99_s26, 2048, %s101_s28, %s88_s30, %s1503_s16, %s1503_s16, %s1504_s20  }
  0x21   : > { %p109_p2 = pnand %p1306_p0, %p108_p1 }
  0x22   : > { %s1605_s21 = sand.u32 (!%p109_p2), 1, %s1493_s7  }
  0x23   : > { %112 = sbr.rel (%p109_p2) target bundleno = 386 (0x182), region = 24  ;;  %s1307_s22 = sshll.u32 (!%p109_p2), %s1605_s21, 7 }
  0x24   : > { %s115_s23 = scalar_lea.sflag (!%p109_p2), [#allocation3], %s1605_s21  ;;  %s1609_s24 = scalar_lea.vmem (!%p109_p2), [#allocation2], %s1307_s22 }
  0x28   : > { %1480 = dma.done.wait (%p1562_p6), %s115_s23, 2048  }
  0x29   : > { %1482 = vsyncadd (%p1562_p6), %s115_s23, 4294965248  ;;  %v140_v0 = vlaneseq  ;;  %vm166_vm0 = vcmask 130048   ;;  %v1309_v7 = vld [vmem:[%s1609_s24 + $0x10] sm:$0xff]  ;;  %v1310_v8 = vld [vmem:[%s1609_s24 + $0x18] sm:$0xff]  ;;  %v1505_v9 = vmov 0.0   ;;  %v1506_v21 = vmov 1.0  }
  0x2a   : > { %v168_v12 = vsel %vm166_vm0, %v1309_v7, 0  ;;  %v1311_v13 = vld [vmem:[%s1609_s24 + $0x50] sm:$0xff]  ;;  %v171_v17 = vsel %vm166_vm0, %v1310_v8, 0  ;;  %v1312_v43 = vld [vmem:[%s1609_s24 + $0x58] sm:$0xff]  ;;  %v151_v52 = vld [vmem:[%s1609_s24] sm:$0xff]  ;;  %s1308_s17 = sshll.u32 %s1605_s21, 5 }
  0x2b   : > { %v143_v1 = vshrl.u32 %v140_v0, 7  ;;  %v1615_v2 = vand.u32 127, %v140_v0  ;;  %v1645_v15 = vand.u32 4294901760, %v168_v12  ;;  %v1654_v20 = vand.u32 4294901760, %v171_v17  ;;  %v152_v59 = vld [vmem:[%s1609_s24 + $0x8] sm:$0xff]  ;;  %s1978_s25 = scalar_lea.vmem [#allocation5], %s1308_s17 }
  0x2c   : > { %v174_v24 = vsel %vm166_vm0, %v1311_v13, 0  ;;  %v177_v48 = vsel %vm166_vm0, %v1312_v43, 0  ;;  %v420_v53 = vsel %vm166_vm0, %v151_v52, 0  ;;  %v423_v61 = vsel %vm166_vm0, %v152_v59, 0  ;;  %v154_v13 = vld [vmem:[%s1609_s24 + $0x48] sm:$0xff]  ;;  %s1352_s26 = sshll.u32 %s1540_s10, 5 }
  0x2d   : > { %v144_v3 = vadd.s32 8, %v143_v1  ;;  %v1617_v4 = vmul.u32 2, %v143_v1  ;;  %v196_v23 = vsub.f32 %v168_v12, %v1645_v15  ;;  %v204_v29 = vsub.f32 %v171_v17, %v1654_v20  ;;  %s1222_s29 = scalar_lea.hbm %s2029_s1, %s1352_s26  ;;  %s1223_s30 = sshll.u32 %s1978_s25, 4  ;;  %s1224_s30 = int_to_ptr.vmem [resolvable:$true] %s1223_s30 }
  0x2e   : > { %v1679_v37 = vand.u32 4294901760, %v174_v24  ;;  %v1693_v51 = vand.u32 4294901760, %v177_v48  ;;  %v1718_v56 = vand.u32 4294901760, %v420_v53  ;;  %v1731_v0 = vand.u32 4294901760, %v423_v61  ;;  %s1225_s10 = sshll.u32 %s1222_s29, 4  ;;  %s1211_s2 = scalar_lea.sflag [#allocation4], %s1605_s21  ;;  %s1226_s10 = int_to_ptr.hbm [resolvable:$true] %s1225_s10 }
  0x2f   : > { %v1619_v5 = vmul.u32 2, %v144_v3  ;;  %v1622_v6 = vadd.s32 1, %v1617_v4  ;;  %vm147_vm1 = vcmp.eq.s32.totalorder %v1615_v2, %v1617_v4  ;;  %v197_v30 = vand.u32 4294901760, %v196_v23  ;;  %v153_v3 = vld [vmem:[%s1609_s24 + $0x40] sm:$0xff]  ;;  %s1449_s3 = sshra.s32 %s1226_s10, 4  ;;  %s1455_s13 = scalar_lea.hbm %s2029_s1, 64  ;;  %s1450_s3 = int_to_ptr.hbm [resolvable:$true] %s1449_s3 }
  0x30   : > { %v149_v10 = vsel %vm147_vm1, 1.0, %v1505_v9  ;;  %v205_v36 = vand.u32 4294901760, %v204_v29  ;;  %v212_v47 = vsub.f32 %v174_v24, %v1679_v37  ;;  %v220_v55 = vsub.f32 %v177_v48, %v1693_v51  ;;  %s1451_s4 = scalar_lea.hbm %s1450_s3, 32  ;;  %p1456_p0 = scmp.lt.s32.totalorder %s1450_s3, %s2029_s1 }
  0x31   : > { %v1633_v11 = vadd.s32 1, %v1619_v5  ;;  %vm157_vm2 = vcmp.eq.s32.totalorder %v1615_v2, %v1622_v6  ;;  %vm148_vm3 = vcmp.eq.s32.totalorder %v1615_v2, %v1619_v5  ;;  %v499_v25 = vsub.f32 %v149_v10, %v149_v10  ;;  %p1452_p6 = scmp.ne.s32.totalorder %s1450_s3, %s1451_s4  ;;  %p1457_p1 = scmp.lt.s32.totalorder %s1455_s13, %s1451_s4 }
  0x32   : > { %v159_v14 = vsel %vm157_vm2, 1.0, %v1505_v9  ;;  %v150_v16 = vsel %vm148_vm3, 1.0, %v1505_v9  ;;  %v198_v35 = vsub.f32 %v196_v23, %v197_v30  ;;  %v206_v46 = vsub.f32 %v204_v29, %v205_v36 }
  0x33   : > { %vm158_vm4 = vcmp.eq.s32.totalorder %v1615_v2, %v1633_v11  ;;  %v247_v18 = vsub.f32 %v159_v14, %v159_v14  ;;  %v494_v19 = vsub.f32 %v150_v16, %v150_v16  ;;  %v500_v31 = vand.u32 4294901760, %v499_v25  ;;  %p1453_p9 = pnand %p1452_p6, %p1569_p11  ;;  %p1458_p3 = por %p1457_p1, %p1456_p0 }
  0x34   : > { %1313 = vmatpush.msk.msra.mxu0 %vm158_vm4, %v1506_v21  ;;  %v160_v22 = vsel %vm158_vm4, 1.0, %v1505_v9  ;;  %1315 = vmatpush.msk.msra.mxu3 %vm158_vm4, %v1506_v21  ;;  %v199_v41 = vand.u32 4294901760, %v198_v35  ;;  %v207_v49 = vand.u32 4294901760, %v206_v46  ;;  %v213_v50 = vand.u32 4294901760, %v212_v47 }
  0x35   : > { %v242_v26 = vsub.f32 %v160_v22, %v160_v22  ;;  %v495_v27 = vand.u32 4294901760, %v494_v19  ;;  %v248_v28 = vand.u32 4294901760, %v247_v18  ;;  %v501_v38 = vsub.f32 %v499_v25, %v500_v31  ;;  %p1454_p13 = pneg %p1453_p9 }
  0x36   : > { %1314 = vmatpush.msk.msra.mxu0 %vm157_vm2, %v1506_v21  ;;  %1316 = vmatpush.msk.msra.mxu3 %vm157_vm2, %v1506_v21  ;;  %v214_v54 = vsub.f32 %v212_v47, %v213_v50  ;;  %v221_v58 = vand.u32 4294901760, %v220_v55  ;;  %v1727_v60 = vsub.f32 %v420_v53, %v1718_v56  ;;  %v1739_v7 = vsub.f32 %v423_v61, %v1731_v0 }
  0x37   : > { %284 = vmatpush.msra.mxu2 %v242_v26  ;;  %v243_v32 = vand.u32 4294901760, %v242_v26  ;;  %v496_v33 = vsub.f32 %v494_v19, %v495_v27  ;;  %v249_v34 = vsub.f32 %v247_v18, %v248_v28  ;;  %327 = vmatmul.f32.vlgmr.msra.gmra.mxu3 %v197_v30  ;;  %v502_v42 = vand.u32 4294901760, %v501_v38  ;;  %p1459_p4 = pnand %p1458_p3, %p1454_p13 }
  0x38   : > { %200 = vmatmul.f32.vlgmr.msra.gmra.mxu0 %v199_v41  ;;  %v215_v57 = vand.u32 4294901760, %v214_v54  ;;  %v222_v62 = vsub.f32 %v220_v55, %v221_v58  ;;  %v449_v63 = vand.u32 4294901760, %v1727_v60  ;;  %v426_v8 = vsel %vm166_vm0, %v153_v3, 0  ;;  %v1325_v41 = vld [vmem:[%s1609_s24 + $0x20] sm:$0xff] }
  0x39   : > { %286 = vmatpush.msra.mxu2 %v247_v18  ;;  %v244_v39 = vsub.f32 %v242_v26, %v243_v32  ;;  %365 = vmatpush.msrb.mxu0 %v243_v32  ;;  %v497_v40 = vand.u32 4294901760, %v496_v33  ;;  %v250_v45 = vand.u32 4294901760, %v249_v34  ;;  %v457_v11 = vand.u32 4294901760, %v1739_v7  ;;  %v1327_v54 = vld [vmem:[%s1609_s24 + $0x60] sm:$0xff] }
  0x3a   : > { %289 = vmatmul.f32.vlgmr.msra.gmra.mxu2 %v196_v23  ;;  %v223_v1 = vand.u32 4294901760, %v222_v62  ;;  %v450_v6 = vsub.f32 %v1727_v60, %v449_v63  ;;  %v1743_v12 = vand.u32 4294901760, %v426_v8  ;;  %v429_v17 = vsel %vm166_vm0, %v154_v13, 0 }
  0x3b   : > { %1319 = vmatpush.msk.msrb.mxu2 %vm148_vm3, %v1506_v21  ;;  %v245_v44 = vand.u32 4294901760, %v244_v39  ;;  %498 = vmatpush.msrb.mxu3 %v497_v40  ;;  %v458_v14 = vsub.f32 %v1739_v7, %v457_v11  ;;  %v672_v18 = vadd.s32 32, %v1619_v5  ;;  %v1758_v23 = vand.u32 4294901760, %v429_v17 }
  0x3c   : > { %368 = vmatpush.msrb.mxu0 %v248_v28  ;;  %v451_v10 = vand.u32 4294901760, %v450_v6  ;;  %v1752_v16 = vsub.f32 %v426_v8, %v1743_v12  ;;  %v671_v33 = vadd.s32 32, %v1617_v4  ;;  %vm1205_vm9 = vcmask 523264  }
  0x3d   : > { %246 = vmatpush.msra.mxu1 %v245_v44  ;;  %1320 = vmatpush.msk.msrb.mxu2 %vm147_vm1, %v1506_v21  ;;  %vm674_vm5 = vcmp.eq.s32.totalorder %v1615_v2, %v672_v18  ;;  %v683_v44 = vsel %vm166_vm0, %v1325_v41, 0  ;;  %v1336_v18 = vld [vmem:[%s1609_s24 + $0x38] sm:$0xff] }
  0x3e   : > { %503 = vmatpush.msrb.mxu3 %v502_v42  ;;  %536 = vmatpush.msra.mxu0 %v494_v19  ;;  %v459_v19 = vand.u32 4294901760, %v458_v14  ;;  %v465_v22 = vand.u32 4294901760, %v1752_v16  ;;  %v676_v24 = vsel %vm674_vm5, 1.0, %v1505_v9  ;;  %vm673_vm6 = vcmp.eq.s32.totalorder %v1615_v2, %v671_v33 }
  0x3f   : > { %251 = vmatpush.msra.mxu1 %v250_v45  ;;  %617 = vmatpush.msra.mxu2 %v495_v27  ;;  %v1776_v27 = vsub.f32 %v429_v17, %v1758_v23  ;;  %v675_v35 = vsel %vm673_vm6, 1.0, %v1505_v9  ;;  %v1833_v46 = vand.u32 4294901760, %v683_v44 }
  0x40   : > { %253 = vmatmul.f32.vlgmr.msra.gmra.mxu1 %v1645_v15  ;;  %333 = vmatmul.f32.gmra.mxu3 %v205_v36  ;;  %v466_v26 = vsub.f32 %v1752_v16, %v465_v22 }
  0x41   : > { %1317 = vmatpush.msk.msrb.mxu1 %vm158_vm4, %v1506_v21  ;;  %1323 = vmatpush.msk.msra.mxu3 %vm148_vm3, %v1506_v21  ;;  %v711_v48 = vsub.f32 %v683_v44, %v1833_v46 }
  0x42   : > { %294 = vmatmul.f32.gmra.mxu2 %v204_v29  ;;  %208 = vmatmul.f32.gmra.mxu0 %v207_v49  ;;  %v467_v30 = vand.u32 4294901760, %v466_v26  ;;  %v938_v49 = vadd.s32 33, %v1617_v4 }
  0x43   : > { %1318 = vmatpush.msk.msrb.mxu1 %vm157_vm2, %v1506_v21  ;;  %620 = vmatpush.msra.mxu2 %v500_v31  ;;  %v473_v31 = vand.u32 4294901760, %v1776_v27  ;;  %v712_v52 = vand.u32 4294901760, %v711_v48 }
  0x44   : > { %538 = vmatpush.msra.mxu0 %v499_v25  ;;  %1324 = vmatpush.msk.msra.mxu3 %vm147_vm1, %v1506_v21  ;;  %v757_v25 = vsub.f32 %v676_v24, %v676_v24  ;;  %vm940_vm8 = vcmp.eq.s32.totalorder %v1615_v2, %v938_v49 }
  0x45   : > { %1321 = vmatpush.msk.msra.mxu1 %vm148_vm3, %v1506_v21  ;;  %v474_v32 = vsub.f32 %v1776_v27, %v473_v31 }
  0x46   : > { %v758_v28 = vand.u32 4294901760, %v757_v25 }
  0x47   : > { %1322 = vmatpush.msk.msra.mxu1 %vm147_vm1, %v1506_v21  ;;  %v475_v34 = vand.u32 4294901760, %v474_v32 }
  0x48   : > { %257 = vmatmul.f32.gmra.mxu1 %v1654_v20  ;;  %339 = vmatmul.f32.gmra.mxu3 %v213_v50  ;;  %v759_v29 = vsub.f32 %v757_v25, %v758_v28 }
  0x4a   : > { %299 = vmatmul.f32.gmra.mxu2 %v212_v47  ;;  %216 = vmatmul.f32.gmra.mxu0 %v215_v57  ;;  %v1326_v47 = vld [vmem:[%s1609_s24 + $0x28] sm:$0xff] }
  0x4b   : > { %v686_v50 = vsel %vm166_vm0, %v1326_v47, 0 }
  0x4c   : > { %v1851_v53 = vand.u32 4294901760, %v686_v50 }
  0x50   : > { %261 = vmatmul.f32.gmra.mxu1 %v1679_v37  ;;  %345 = vmatmul.f32.gmra.mxu3 %v221_v58  ;;  %v689_v58 = vsel %vm166_vm0, %v1327_v54, 0 }
  0x51   : > { %v1860_v62 = vand.u32 4294901760, %v689_v58 }
  0x52   : > { %304 = vmatmul.f32.gmra.mxu2 %v220_v55  ;;  %224 = vmatmul.f32.gmra.mxu0 %v223_v1 }
  0x53   : > { %v727_v1 = vsub.f32 %v689_v58, %v1860_v62 }
  0x58   : > { %265 = vmatmul.f32.gmra.mxu1 %v1693_v51  ;;  %505 = vmatmul.f32.vlgmr.msrb.gmra.mxu3 %v1718_v56 }
  0x59   : > { %1331 = vmatpush.msk.msrb.mxu3 %vm674_vm5, %v1506_v21 }
  0x5a   : > { %452 = vmatmul.f32.vlgmr.msrb.gmra.mxu2 %v451_v10  ;;  %370 = vmatmul.f32.vlgmr.msrb.gmra.mxu0 %v1645_v15  ;;  %v1335_v10 = vld [vmem:[%s1609_s24 + $0x30] sm:$0xff] }
  0x5b   : > { %1329 = vmatpush.msk.msrb.mxu0 %vm674_vm5, %v1506_v21  ;;  %799 = vmatpush.msrb.mxu2 %v757_v25  ;;  %v1337_v25 = vld [vmem:[%s1609_s24 + $0x70] sm:$0xff] }
  0x5c   : > { %1332 = vmatpush.msk.msrb.mxu3 %vm673_vm6, %v1506_v21 }
  0x5d   : > { %1330 = vmatpush.msk.msrb.mxu0 %vm673_vm6, %v1506_v21 }
  0x60   : > { %403 = vmatmul.f32.vlgmr.msrb.gmra.mxu1 %v1645_v15  ;;  %509 = vmatmul.f32.gmra.mxu3 %v1731_v0  ;;  %v760_v15 = vand.u32 4294901760, %v759_v29 }
  0x62   : > { %460 = vmatmul.f32.gmra.mxu2 %v459_v19  ;;  %374 = vmatmul.f32.gmra.mxu0 %v1654_v20 }
  0x63   : > { %761 = vmatpush.msrb.mxu1 %v760_v15  ;;  %v1338_v15 = vld [vmem:[%s1609_s24 + $0x78] sm:$0xff] }
  0x68   : > { %407 = vmatmul.f32.gmra.mxu1 %v1654_v20  ;;  %513 = vmatmul.f32.gmra.mxu3 %v1743_v12  ;;  %v762_v20 = vsub.f32 %v675_v35, %v675_v35 }
  0x6a   : > { %468 = vmatmul.f32.gmra.mxu2 %v467_v30  ;;  %378 = vmatmul.f32.gmra.mxu0 %v1679_v37  ;;  %v763_v36 = vand.u32 4294901760, %v762_v20 }
  0x6b   : > { %801 = vmatpush.msrb.mxu2 %v762_v20 }
  0x6c   : > { %v764_v38 = vsub.f32 %v762_v20, %v763_v36  ;;  %v959_v20 = vsel %vm166_vm0, %v1338_v15, 0 }
  0x6e   : > { %v765_v39 = vand.u32 4294901760, %v764_v38 }
  0x70   : > { %411 = vmatmul.f32.gmra.mxu1 %v1679_v37  ;;  %517 = vmatmul.f32.gmra.mxu3 %v1758_v23  ;;  %v1805_v37 = vadd.s32 33, %v1619_v5 }
  0x71   : > { %766 = vmatpush.msrb.mxu1 %v765_v39 }
  0x72   : > { %476 = vmatmul.f32.gmra.mxu2 %v475_v34  ;;  %382 = vmatmul.f32.gmra.mxu0 %v1693_v51  ;;  %vm941_vm7 = vcmp.eq.s32.totalorder %v1615_v2, %v1805_v37  ;;  %v953_v2 = vsel %vm166_vm0, %v1336_v18, 0 }
  0x73   : > { %v943_v40 = vsel %vm941_vm7, 1.0, %v1505_v9 }
  0x74   : > { %v1024_v5 = vsub.f32 %v943_v40, %v943_v40 }
  0x76   : > { %v1025_v42 = vand.u32 4294901760, %v1024_v5 }
  0x78   : > { %415 = vmatmul.f32.gmra.mxu1 %v1693_v51  ;;  %655 = vmatmul.f32.vlgmr.msra.gmra.mxu3 %v1718_v56  ;;  %v1026_v43 = vsub.f32 %v1024_v5, %v1025_v42  ;;  %v942_v51 = vsel %vm940_vm8, 1.0, %v1505_v9  ;;  %v713_v9 = vsub.f32 %v711_v48, %v712_v52 }
  0x79   : > { %v1029_v4 = vsub.f32 %v942_v51, %v942_v51 }
  0x7a   : > { %622 = vmatmul.f32.vlgmr.msra.gmra.mxu2 %v1718_v56  ;;  %541 = vmatmul.f32.vlgmr.msra.gmra.mxu0 %v1727_v60  ;;  %v1027_v45 = vand.u32 4294901760, %v1026_v43  ;;  %v719_v56 = vsub.f32 %v686_v50, %v1851_v53  ;;  %v714_v60 = vand.u32 4294901760, %v713_v9 }
  0x7b   : > { %880 = vmatpush.msra.mxu0 %v758_v28  ;;  %1339 = vmatpush.msk.msra.mxu2 %vm941_vm7, %v1506_v21  ;;  %v1030_v55 = vand.u32 4294901760, %v1029_v4  ;;  %v956_v28 = vsel %vm166_vm0, %v1337_v25, 0 }
  0x7c   : > { %1028 = vmatpush.msra.mxu3 %v1027_v45  ;;  %v720_v61 = vand.u32 4294901760, %v719_v56 }
  0x7d   : > { %883 = vmatpush.msra.mxu0 %v763_v36  ;;  %1340 = vmatpush.msk.msra.mxu2 %vm940_vm8, %v1506_v21  ;;  %v1031_v57 = vsub.f32 %v1029_v4, %v1030_v55 }
  0x7f   : > { %v1032_v59 = vand.u32 4294901760, %v1031_v57 }
  0x80   : > { %579 = vmatmul.f32.vlgmr.msra.gmra.mxu1 %v449_v63  ;;  %659 = vmatmul.f32.gmra.mxu3 %v1731_v0  ;;  %v1328_v63 = vld [vmem:[%s1609_s24 + $0x68] sm:$0xff] }
  0x81   : > { %1333 = vmatpush.msk.msra.mxu1 %vm674_vm5, %v1506_v21  ;;  %1033 = vmatpush.msra.mxu3 %v1032_v59  ;;  %v692_v3 = vsel %vm166_vm0, %v1328_v63, 0 }
  0x82   : > { %626 = vmatmul.f32.gmra.mxu2 %v1731_v0  ;;  %546 = vmatmul.f32.gmra.mxu0 %v1739_v7  ;;  %v721_v0 = vsub.f32 %v719_v56, %v720_v61  ;;  %v728_v7 = vand.u32 4294901760, %v727_v1  ;;  %v1873_v8 = vand.u32 4294901760, %v692_v3 }
  0x83   : > { %1334 = vmatpush.msk.msra.mxu1 %vm673_vm6, %v1506_v21 }
  0x84   : > { %v722_v6 = vand.u32 4294901760, %v721_v0  ;;  %v735_v13 = vsub.f32 %v692_v3, %v1873_v8 }
  0x86   : > { %v736_v17 = vand.u32 4294901760, %v735_v13 }
  0x88   : > { %585 = vmatmul.f32.gmra.mxu1 %v457_v11  ;;  %663 = vmatmul.f32.gmra.mxu3 %v1743_v12  ;;  %v950_v11 = vsel %vm166_vm0, %v1335_v10, 0 }
  0x89   : > { %v1885_v14 = vand.u32 4294901760, %v950_v11 }
  0x8a   : > { %630 = vmatmul.f32.gmra.mxu2 %v1743_v12  ;;  %551 = vmatmul.f32.gmra.mxu0 %v1752_v16  ;;  %v729_v12 = vsub.f32 %v727_v1, %v728_v7 }
  0x8b   : > { %v1890_v19 = vsub.f32 %v950_v11, %v1885_v14 }
  0x8c   : > { %v730_v16 = vand.u32 4294901760, %v729_v12 }
  0x90   : > { %591 = vmatmul.f32.gmra.mxu1 %v465_v22  ;;  %667 = vmatmul.f32.gmra.mxu3 %v1758_v23  ;;  %v979_v22 = vand.u32 4294901760, %v1890_v19 }
  0x92   : > { %634 = vmatmul.f32.gmra.mxu2 %v1758_v23  ;;  %556 = vmatmul.f32.gmra.mxu0 %v1776_v27  ;;  %v1894_v23 = vand.u32 4294901760, %v953_v2  ;;  %v980_v26 = vsub.f32 %v1890_v19, %v979_v22 }
  0x94   : > { %v1902_v27 = vsub.f32 %v953_v2, %v1894_v23  ;;  %v981_v29 = vand.u32 4294901760, %v980_v26 }
  0x96   : > { %v987_v30 = vand.u32 4294901760, %v1902_v27 }
  0x98   : > { %597 = vmatmul.f32.gmra.mxu1 %v473_v31  ;;  %842 = vmatmul.f32.vlgmr.msrb.gmra.mxu3 %v712_v52  ;;  %v1906_v31 = vand.u32 4294901760, %v956_v28  ;;  %v988_v33 = vsub.f32 %v1902_v27, %v987_v30 }
  0x99   : > { %1343 = vmatpush.msk.msrb.mxu3 %vm941_vm7, %v1506_v21 }
  0x9a   : > { %804 = vmatmul.f32.vlgmr.msrb.gmra.mxu2 %v711_v48  ;;  %715 = vmatmul.f32.vlgmr.msrb.gmra.mxu0 %v714_v60  ;;  %v1915_v34 = vsub.f32 %v956_v28, %v1906_v31  ;;  %v989_v37 = vand.u32 4294901760, %v988_v33 }
  0x9b   : > { %1147 = vmatpush.msrb.mxu2 %v1025_v42  ;;  %1344 = vmatpush.msk.msrb.mxu3 %vm940_vm8, %v1506_v21 }
  0x9c   : > { %1066 = vmatpush.msrb.mxu0 %v1024_v5  ;;  %v995_v40 = vand.u32 4294901760, %v1915_v34  ;;  %v1920_v5 = vand.u32 4294901760, %v959_v20 }
  0x9d   : > { %1150 = vmatpush.msrb.mxu2 %v1030_v55 }
  0x9e   : > { %1068 = vmatpush.msrb.mxu0 %v1029_v4  ;;  %v996_v44 = vsub.f32 %v1915_v34, %v995_v40  ;;  %v1928_v45 = vsub.f32 %v959_v20, %v1920_v5 }
  0xa0   : > { %768 = vmatmul.f32.vlgmr.msrb.gmra.mxu1 %v1833_v46  ;;  %848 = vmatmul.f32.gmra.mxu3 %v720_v61  ;;  %v997_v51 = vand.u32 4294901760, %v996_v44 }
  0xa1   : > { %1341 = vmatpush.msk.msrb.mxu1 %vm941_vm7, %v1506_v21 }
  0xa2   : > { %809 = vmatmul.f32.gmra.mxu2 %v719_v56  ;;  %723 = vmatmul.f32.gmra.mxu0 %v722_v6 }
  0xa3   : > { %1342 = vmatpush.msk.msrb.mxu1 %vm940_vm8, %v1506_v21  ;;  %v737_v21 = vsub.f32 %v735_v13, %v736_v17 }
  0xa5   : > { %v738_v24 = vand.u32 4294901760, %v737_v21 }
  0xa8   : > { %772 = vmatmul.f32.gmra.mxu1 %v1851_v53  ;;  %854 = vmatmul.f32.gmra.mxu3 %v728_v7 }
  0xaa   : > { %814 = vmatmul.f32.gmra.mxu2 %v727_v1  ;;  %731 = vmatmul.f32.gmra.mxu0 %v730_v16 }
  0xb0   : > { %776 = vmatmul.f32.gmra.mxu1 %v1860_v62  ;;  %860 = vmatmul.f32.gmra.mxu3 %v736_v17 }
  0xb2   : > { %819 = vmatmul.f32.gmra.mxu2 %v735_v13  ;;  %739 = vmatmul.f32.gmra.mxu0 %v738_v24 }
  0xb5   : > { %v201_v32 = vpop.f32.mrf.mxu0 }
  0xb8   : > { %780 = vmatmul.f32.gmra.mxu1 %v1873_v8  ;;  %1035 = vmatmul.f32.vlgmr.msra.gmra.mxu3 %v1885_v14 }
  0xba   : > { %982 = vmatmul.f32.vlgmr.msra.gmra.mxu2 %v981_v29  ;;  %v328_v35 = vpop.f32.mrf.mxu3  ;;  %885 = vmatmul.f32.vlgmr.msra.gmra.mxu0 %v1833_v46 }
  0xbd   : > { %v254_v36 = vpop.f32.mrf.mxu1  ;;  %v290_v38 = vpop.f32.mrf.mxu2 }
  0xbe   : > { %v255_v39 = vadd.f32 %v254_v36, %v201_v32 }
  0xbf   : > { %v209_v42 = vpop.f32.mrf.mxu0 }
  0xc0   : > { %v291_v41 = vadd.f32 %v290_v38, %v255_v39  ;;  %918 = vmatmul.f32.vlgmr.msra.gmra.mxu1 %v1833_v46  ;;  %1039 = vmatmul.f32.gmra.mxu3 %v1894_v23  ;;  %v1003_v46 = vand.u32 4294901760, %v1928_v45 }
  0xc2   : > { %v329_v43 = vadd.f32 %v328_v35, %v291_v41  ;;  %990 = vmatmul.f32.gmra.mxu2 %v989_v37  ;;  %889 = vmatmul.f32.gmra.mxu0 %v1851_v53  ;;  %v1004_v55 = vsub.f32 %v1928_v45, %v1003_v46 }
  0xc3   : > { %v334_v47 = vpop.f32.mrf.mxu3 }
  0xc4   : > { %v1005_v59 = vand.u32 4294901760, %v1004_v55 }
  0xc5   : > { %v258_v48 = vpop.f32.mrf.mxu1  ;;  %v295_v49 = vpop.f32.mrf.mxu2 }
  0xc6   : > { %v259_v50 = vadd.f32 %v258_v48, %v209_v42 }
  0xc7   : > { %v217_v4 = vpop.f32.mrf.mxu0 }
  0xc8   : > { %v296_v52 = vadd.f32 %v295_v49, %v259_v50  ;;  %922 = vmatmul.f32.gmra.mxu1 %v1851_v53  ;;  %1043 = vmatmul.f32.gmra.mxu3 %v1906_v31 }
  0xca   : > { %v335_v54 = vadd.f32 %v334_v47, %v296_v52  ;;  %998 = vmatmul.f32.gmra.mxu2 %v997_v51  ;;  %893 = vmatmul.f32.gmra.mxu0 %v1860_v62 }
  0xcb   : > { %v340_v9 = vpop.f32.mrf.mxu3 }
  0xcd   : > { %v262_v56 = vpop.f32.mrf.mxu1  ;;  %v300_v57 = vpop.f32.mrf.mxu2 }
  0xce   : > { %v263_v58 = vadd.f32 %v262_v56, %v217_v4 }
  0xcf   : > { %v225_v53 = vpop.f32.mrf.mxu0 }
  0xd0   : > { %v301_v60 = vadd.f32 %v300_v57, %v263_v58  ;;  %926 = vmatmul.f32.gmra.mxu1 %v1860_v62  ;;  %1047 = vmatmul.f32.gmra.mxu3 %v1920_v5 }
  0xd2   : > { %v341_v61 = vadd.f32 %v340_v9, %v301_v60  ;;  %1006 = vmatmul.f32.gmra.mxu2 %v1005_v59  ;;  %897 = vmatmul.f32.gmra.mxu0 %v1873_v8 }
  0xd3   : > { %v346_v63 = vpop.f32.mrf.mxu3 }
  0xd5   : > { %v266_v0 = vpop.f32.mrf.mxu1  ;;  %v305_v1 = vpop.f32.mrf.mxu2 }
  0xd6   : > { %v267_v3 = vadd.f32 %v266_v0, %v225_v53 }
  0xd7   : > { %v371_v7 = vpop.f32.mrf.mxu0 }
  0xd8   : > { %v306_v6 = vadd.f32 %v305_v1, %v267_v3  ;;  %930 = vmatmul.f32.gmra.mxu1 %v1873_v8  ;;  %1185 = vmatmul.f32.vlgmr.msrb.gmra.mxu3 %v1885_v14  ;;  %v372_v11 = vadd.f32 %v371_v7, %v329_v43 }
  0xda   : > { %v347_v10 = vadd.f32 %v346_v63, %v306_v6  ;;  %1152 = vmatmul.f32.vlgmr.msrb.gmra.mxu2 %v1885_v14  ;;  %1071 = vmatmul.f32.vlgmr.msrb.gmra.mxu0 %v1890_v19 }
  0xdb   : > { %v506_v62 = vpop.f32.mrf.mxu3 }
  0xdd   : > { %v404_v12 = vpop.f32.mrf.mxu1  ;;  %v453_v13 = vpop.f32.mrf.mxu2 }
  0xde   : > { %v405_v16 = vadd.f32 %v404_v12, %v372_v11 }
  0xdf   : > { %v375_v8 = vpop.f32.mrf.mxu0 }
  0xe0   : > { %v454_v17 = vadd.f32 %v453_v13, %v405_v16  ;;  %1109 = vmatmul.f32.vlgmr.msrb.gmra.mxu1 %v979_v22  ;;  %1189 = vmatmul.f32.gmra.mxu3 %v1894_v23  ;;  %v376_v2 = vadd.f32 %v375_v8, %v335_v54 }
  0xe2   : > { %v507_v18 = vadd.f32 %v506_v62, %v454_v17  ;;  %1156 = vmatmul.f32.gmra.mxu2 %v1894_v23  ;;  %1076 = vmatmul.f32.gmra.mxu0 %v1902_v27 }
  0xe3   : > { %v510_v21 = vpop.f32.mrf.mxu3 }
  0xe5   : > { %v408_v14 = vpop.f32.mrf.mxu1  ;;  %v461_v24 = vpop.f32.mrf.mxu2 }
  0xe6   : > { %v409_v25 = vadd.f32 %v408_v14, %v376_v2 }
  0xe7   : > { %v379_v19 = vpop.f32.mrf.mxu0 }
  0xe8   : > { %v462_v26 = vadd.f32 %v461_v24, %v409_v25  ;;  %1115 = vmatmul.f32.gmra.mxu1 %v987_v30  ;;  %1193 = vmatmul.f32.gmra.mxu3 %v1906_v31  ;;  %v380_v28 = vadd.f32 %v379_v19, %v341_v61 }
  0xea   : > { %v511_v22 = vadd.f32 %v510_v21, %v462_v26  ;;  %1160 = vmatmul.f32.gmra.mxu2 %v1906_v31  ;;  %1081 = vmatmul.f32.gmra.mxu0 %v1915_v34 }
  0xeb   : > { %v514_v29 = vpop.f32.mrf.mxu3 }
  0xed   : > { %v412_v23 = vpop.f32.mrf.mxu1  ;;  %v469_v15 = vpop.f32.mrf.mxu2 }
  0xee   : > { %v413_v32 = vadd.f32 %v412_v23, %v380_v28 }
  0xef   : > { %v383_v27 = vpop.f32.mrf.mxu0 }
  0xf0   : > { %v470_v33 = vadd.f32 %v469_v15, %v413_v32  ;;  %1121 = vmatmul.f32.gmra.mxu1 %v995_v40  ;;  %1197 = vmatmul.f32.gmra.mxu3 %v1920_v5  ;;  %v384_v35 = vadd.f32 %v383_v27, %v347_v10 }
  0xf2   : > { %v515_v30 = vadd.f32 %v514_v29, %v470_v33  ;;  %1164 = vmatmul.f32.gmra.mxu2 %v1920_v5  ;;  %1086 = vmatmul.f32.gmra.mxu0 %v1928_v45 }
  0xf3   : > { %v518_v20 = vpop.f32.mrf.mxu3 }
  0xf5   : > { %v416_v31 = vpop.f32.mrf.mxu1  ;;  %v477_v36 = vpop.f32.mrf.mxu2 }
  0xf6   : > { %v417_v38 = vadd.f32 %v416_v31, %v384_v35 }
  0xf7   : > { %v542_v37 = vpop.f32.mrf.mxu0 }
  0xf8   : > { %v478_v39 = vadd.f32 %v477_v36, %v417_v38  ;;  %1127 = vmatmul.f32.gmra.mxu1 %v1003_v46  ;;  %v543_v40 = vadd.f32 %v542_v37, %v507_v18 }
  0xfa   : > { %v519_v34 = vadd.f32 %v518_v20, %v478_v39 }
  0xfb   : > { %v656_v41 = vpop.f32.mrf.mxu3 }
  0xfd   : > { %v580_v42 = vpop.f32.mrf.mxu1  ;;  %v623_v43 = vpop.f32.mrf.mxu2 }
  0xfe   : > { %v581_v44 = vadd.f32 %v580_v42, %v543_v40 }
  0xff   : > { %v547_v48 = vpop.f32.mrf.mxu0 }
 0x100   : > { %v624_v47 = vadd.f32 %v623_v43, %v581_v44  ;;  %v548_v49 = vadd.f32 %v547_v48, %v511_v22 }
 0x102   : > { %v1962_v5 = vadd.f32 %v656_v41, %v624_v47 }
 0x103   : > { %v660_v50 = vpop.f32.mrf.mxu3 }
 0x105   : > { %v586_v51 = vpop.f32.mrf.mxu1  ;;  %v627_v52 = vpop.f32.mrf.mxu2 }
 0x106   : > { %v587_v4 = vadd.f32 %v586_v51, %v548_v49 }
 0x107   : > { %v552_v55 = vpop.f32.mrf.mxu0 }
 0x108   : > { %v628_v54 = vadd.f32 %v627_v52, %v587_v4  ;;  %v553_v46 = vadd.f32 %v552_v55, %v515_v30 }
 0x10a   : > { %v1964_v45 = vadd.f32 %v660_v50, %v628_v54 }
 0x10b   : > { %v664_v9 = vpop.f32.mrf.mxu3 }
 0x10d   : > { %v592_v56 = vpop.f32.mrf.mxu1  ;;  %v631_v57 = vpop.f32.mrf.mxu2 }
 0x10e   : > { %v593_v58 = vadd.f32 %v592_v56, %v553_v46 }
 0x10f   : > { %v557_v60 = vpop.f32.mrf.mxu0 }
 0x110   : > { %v632_v59 = vadd.f32 %v631_v57, %v593_v58  ;;  %v558_v61 = vadd.f32 %v557_v60, %v519_v34 }
 0x112   : > { %v1966_v53 = vadd.f32 %v664_v9, %v632_v59 }
 0x113   : > { %v668_v63 = vpop.f32.mrf.mxu3 }
 0x115   : > { %v598_v0 = vpop.f32.mrf.mxu1  ;;  %v635_v1 = vpop.f32.mrf.mxu2 }
 0x116   : > { %v599_v3 = vadd.f32 %v598_v0, %v558_v61 }
 0x117   : > { %v716_v7 = vpop.f32.mrf.mxu0 }
 0x118   : > { %v636_v6 = vadd.f32 %v635_v1, %v599_v3 }
 0x11a   : > { %v1968_v10 = vadd.f32 %v668_v63, %v636_v6 }
 0x11b   : > { %v843_v11 = vpop.f32.mrf.mxu3 }
 0x11d   : > { %v769_v62 = vpop.f32.mrf.mxu1  ;;  %v805_v12 = vpop.f32.mrf.mxu2 }
 0x11e   : > { %v770_v38 = vadd.f32 %v769_v62, %v716_v7 }
 0x11f   : > { %v724_v13 = vpop.f32.mrf.mxu0 }
 0x120   : > { %v806_v40 = vadd.f32 %v805_v12, %v770_v38 }
 0x122   : > { %v844_v42 = vadd.f32 %v843_v11, %v806_v40 }
 0x123   : > { %v849_v16 = vpop.f32.mrf.mxu3 }
 0x125   : > { %v773_v17 = vpop.f32.mrf.mxu1  ;;  %v810_v8 = vpop.f32.mrf.mxu2 }
 0x126   : > { %v774_v43 = vadd.f32 %v773_v17, %v724_v13 }
 0x127   : > { %v732_v18 = vpop.f32.mrf.mxu0 }
 0x128   : > { %v811_v52 = vadd.f32 %v810_v8, %v774_v43 }
 0x12a   : > { %v850_v56 = vadd.f32 %v849_v16, %v811_v52 }
 0x12b   : > { %v855_v2 = vpop.f32.mrf.mxu3 }
 0x12d   : > { %v777_v21 = vpop.f32.mrf.mxu1  ;;  %v815_v14 = vpop.f32.mrf.mxu2 }
 0x12e   : > { %v778_v46 = vadd.f32 %v777_v21, %v732_v18 }
 0x12f   : > { %v740_v24 = vpop.f32.mrf.mxu0 }
 0x130   : > { %v816_v1 = vadd.f32 %v815_v14, %v778_v46 }
 0x133   : > { %v1970_v25 = vpop.f32.mrf.mxu3 }
 0x135   : > { %v781_v26 = vpop.f32.mrf.mxu1  ;;  %v1972_v19 = vpop.f32.mrf.mxu2 }
 0x136   : > { %v782_v13 = vadd.f32 %v781_v26, %v740_v24 }
 0x137   : > { %v886_v22 = vpop.f32.mrf.mxu0 }
 0x138   : > { %v887_v48 = vadd.f32 %v886_v22, %v844_v42 }
 0x13b   : > { %v1036_v28 = vpop.f32.mrf.mxu3 }
 0x13d   : > { %v919_v29 = vpop.f32.mrf.mxu1  ;;  %v983_v23 = vpop.f32.mrf.mxu2 }
 0x13e   : > { %v1037_v44 = vadd.f32 %v1036_v28, %v983_v23  ;;  %v920_v4 = vadd.f32 %v919_v29, %v887_v48  ;;  %v821_v23 = vadd.f32 %v1972_v19, %v782_v13 }
 0x13f   : > { %v890_v15 = vpop.f32.mrf.mxu0 }
 0x140   : > { %v934_v57 = vadd.f32 %v920_v4, %v1962_v5  ;;  %v891_v61 = vadd.f32 %v890_v15, %v850_v56  ;;  %v856_v5 = vadd.f32 %v855_v2, %v816_v1 }
 0x143   : > { %v1040_v32 = vpop.f32.mrf.mxu3 }
 0x145   : > { %v923_v33 = vpop.f32.mrf.mxu1  ;;  %v991_v27 = vpop.f32.mrf.mxu2 }
 0x146   : > { %v1041_v58 = vadd.f32 %v1040_v32, %v991_v27  ;;  %v924_v7 = vadd.f32 %v923_v33, %v891_v61 }
 0x147   : > { %v894_v30 = vpop.f32.mrf.mxu0 }
 0x148   : > { %v935_v16 = vadd.f32 %v924_v7, %v1964_v45  ;;  %v895_v18 = vadd.f32 %v894_v30, %v856_v5  ;;  %v862_v45 = vadd.f32 %v1970_v25, %v821_v23 }
 0x14b   : > { %v1044_v35 = vpop.f32.mrf.mxu3 }
 0x14d   : > { %v927_v20 = vpop.f32.mrf.mxu1  ;;  %v999_v31 = vpop.f32.mrf.mxu2 }
 0x14e   : > { %v1045_v17 = vadd.f32 %v1044_v35, %v999_v31  ;;  %v928_v15 = vadd.f32 %v927_v20, %v895_v18 }
 0x14f   : > { %v898_v36 = vpop.f32.mrf.mxu0 }
 0x150   : > { %v936_v26 = vadd.f32 %v928_v15, %v1966_v53  ;;  %v899_v30 = vadd.f32 %v898_v36, %v862_v45 }
 0x153   : > { %v1048_v39 = vpop.f32.mrf.mxu3 }
 0x155   : > { %v1974_v37 = vpop.f32.mrf.mxu1  ;;  %v1007_v34 = vpop.f32.mrf.mxu2 }
 0x156   : > { %v1049_v33 = vadd.f32 %v1048_v39, %v1007_v34  ;;  %v932_v38 = vadd.f32 %v1974_v37, %v899_v30 }
 0x157   : > { %v1072_v41 = vpop.f32.mrf.mxu0 }
 0x158   : > { %v1073_v49 = vadd.f32 %v1072_v41, %v1037_v44  ;;  %v937_v36 = vadd.f32 %v932_v38, %v1968_v10 }
 0x15b   : > { %v1186_v47 = vpop.f32.mrf.mxu3 }
 0x15d   : > { %v1110_v50 = vpop.f32.mrf.mxu1  ;;  %v1153_v51 = vpop.f32.mrf.mxu2 }
 0x15e   : > { %v1111_v54 = vadd.f32 %v1110_v50, %v1073_v49 }
 0x15f   : > { %v1077_v9 = vpop.f32.mrf.mxu0 }
 0x160   : > { %v1154_v55 = vadd.f32 %v1153_v51, %v1111_v54  ;;  %v1078_v63 = vadd.f32 %v1077_v9, %v1041_v58 }
 0x162   : > { %v1187_v59 = vadd.f32 %v1186_v47, %v1154_v55 }
 0x163   : > { %v1190_v60 = vpop.f32.mrf.mxu3 }
 0x164   : > { %v1201_v0 = vadd.f32 %v1187_v59, %v934_v57 }
 0x165   : > { %v1116_v3 = vpop.f32.mrf.mxu1  ;;  %v1157_v6 = vpop.f32.mrf.mxu2 }
 0x166   : > { %1206 = vst.msk [vmem:[%s1978_s25] sm:$0xff] %vm1205_vm9, %v1201_v0  ;;  %v1117_v11 = vadd.f32 %v1116_v3, %v1078_v63 }
 0x167   : > { %v1082_v12 = vpop.f32.mrf.mxu0 }
 0x168   : > { %v1158_v62 = vadd.f32 %v1157_v6, %v1117_v11  ;;  %v1083_v21 = vadd.f32 %v1082_v12, %v1045_v17 }
 0x16a   : > { %v1191_v8 = vadd.f32 %v1190_v60, %v1158_v62 }
 0x16b   : > { %v1194_v22 = vpop.f32.mrf.mxu3 }
 0x16c   : > { %v1202_v14 = vadd.f32 %v1191_v8, %v935_v16 }
 0x16d   : > { %v1122_v28 = vpop.f32.mrf.mxu1  ;;  %v1161_v29 = vpop.f32.mrf.mxu2 }
 0x16e   : > { %1207 = vst.msk [vmem:[%s1978_s25 + $0x8] sm:$0xff] %vm1205_vm9, %v1202_v14  ;;  %v1123_v2 = vadd.f32 %v1122_v28, %v1083_v21 }
 0x16f   : > { %v1087_v24 = vpop.f32.mrf.mxu0 }
 0x170   : > { %v1162_v32 = vadd.f32 %v1161_v29, %v1123_v2  ;;  %v1088_v35 = vadd.f32 %v1087_v24, %v1049_v33 }
 0x172   : > { %v1195_v27 = vadd.f32 %v1194_v22, %v1162_v32 }
 0x173   : > { %v1198_v53 = vpop.f32.mrf.mxu3 }
 0x174   : > { %v1203_v31 = vadd.f32 %v1195_v27, %v936_v26 }
 0x175   : > { %v1128_v19 = vpop.f32.mrf.mxu1  ;;  %v1165_v20 = vpop.f32.mrf.mxu2 }
 0x176   : > { %1208 = vst.msk [vmem:[%s1978_s25 + $0x10] sm:$0xff] %vm1205_vm9, %v1203_v31  ;;  %v1129_v25 = vadd.f32 %v1128_v19, %v1088_v35 }
 0x178   : > { %v1166_v39 = vadd.f32 %v1165_v20, %v1129_v25 }
 0x17a   : > { %v1199_v34 = vadd.f32 %v1198_v53, %v1166_v39 }
 0x17c   : > { %v1204_v40 = vadd.f32 %v1199_v34, %v937_v36 }
 0x17e   : > { %1209 = vst.msk [vmem:[%s1978_s25 + $0x18] sm:$0xff] %vm1205_vm9, %v1204_v40 }
 0x17f   : > { %1462 = shalt.err (!%p1459_p4)
}
 0x180   : > { %s1507_s20 = smov 128   ;;  %s1508_s21 = smov 8  }
 0x181   : > { %1355 = dma.vmem_to_hbm [thread:$0]  (%p1569_p11), %s1224_s30, 512, %s1226_s10, %s1211_s2, %s1507_s20, %s1507_s20, %s1508_s21  }
 0x182 PF: > { %s1240_s22 = sand.u32 1, %s1489_s6   ;;  %p2035_p7 = scmp.ge.s32.totalorder %s1501_s9, 2 }
 0x183   : > { %s1241_s23 = scalar_lea.sflag [#allocation4], %s1240_s22 }
 0x184   : > { %p1362_p5 = pnand %p2035_p7, %p1573_p12 }
 0x186   : > { %p1363_p8 = pneg %p1362_p5 }
 0x188   : > { %1484 = dma.done.wait (%p1363_p8), %s1241_s23, 512  }
 0x189   : > { %1486 = vsyncadd (%p1363_p8), %s1241_s23, 4294966784  ;;  %p14_p10 = scmp.ge.s32.totalorder %s1544_s12, 4   ;;  %s2036_s6 = smov %s1493_s7 }
 0x18a   : > { %s2037_s7 = smov %s1497_s8  ;;  %s2038_s8 = smov %s1556_s15 }
 0x18b   : > { %s2039_s9 = smov %s1544_s12  ;;  %16 = sbr.rel (!%p14_p10) target bundleno = 5 (0x5), region = 72 }
 0x190   :  { %1247 = vsyncpa [#allocation3], 1 }
 0x191   :  { %1249 = vsyncpa [#allocation3 + $0x1], 1 }
 0x192   :  { %1250 = vsyncpa [#allocation4], 1 }
 0x193   :  { %1252 = vsyncpa [#allocation4 + $0x1], 1 }

</bundles_post_ra>
